<compile_context>
chip_gen: v5e
topology: v5e:2x2
jax: 0.10.0
libtpu: 0.0.40
codegen_flags: <defaults>
</compile_context>

<pallas_src>
import jax
import jax.numpy as jnp
from jax.experimental import pallas as pl
from jax.experimental.pallas import tpu as pltpu

input_size = 256
hidden_size = 500
num_classes = 4


def _round_up(x, m):
    return (x + m - 1) // m * m


def mlp_kernel(x_ref, w1_ref, b1_ref, w2_ref, b2_ref, o_ref):
    # fc1: [TM, in] @ [in, hid_p] -> f32 accumulate on the MXU.
    h = jnp.dot(x_ref[...], w1_ref[...], preferred_element_type=jnp.float32)
    # bias + ReLU ride in free VPU slots under the MXU-bound matmul.
    h = jnp.maximum(h + b1_ref[...], 0.0)
    # fc2: [TM, hid_p] @ [hid_p, ncls] -> f32 accumulate.  Casting h to the
    # weight dtype (bf16 by default) halves the intermediate's VMEM traffic
    # and keeps fc2 on the cheap bf16 MXU path (big win on MXU-bound v5e).
    out = jnp.dot(h.astype(w2_ref.dtype), w2_ref[...],
                  preferred_element_type=jnp.float32)
    o_ref[...] = (out + b2_ref[...]).astype(o_ref.dtype)


def mlp_forward(x, w1, b1, w2, b2, *, tile_m=1024, use_bf16=True):
    """x: [B, input_size], w1: [in, hid], b1: [hid], w2: [hid, ncls], b2: [ncls]."""
    B, in_f = x.shape
    hid = w1.shape[1]
    n_cls = w2.shape[1]

    hid_p = _round_up(hid, 128)      # 500 -> 512 (lane-dense hidden / fc2 K)

    # Tile rows: multiple of 8, capped so the grid has >= 2 steps when B > 8
    # (lets the "parallel" axis split across v7x's two TensorCores).
    tm_cap = max(8, _round_up(pl.cdiv(B, 2), 8))
    TM = min(_round_up(tile_m, 8), tm_cap)
    grid_m = pl.cdiv(B, TM)          # edge tile handled by Pallas (masked store)

    # Zero padding keeps the math identical (see module docstring).
    w1p = jnp.pad(w1, ((0, 0), (0, hid_p - hid)))
    b1p = jnp.pad(b1, (0, hid_p - hid)).reshape(1, hid_p)
    w2p = jnp.pad(w2, ((0, hid_p - hid), (0, 0)))          # [hid_p, n_cls]
    b2p = b2.reshape(1, n_cls)

    xp = x
    if use_bf16:  # bf16 matmul inputs (MXU-native everywhere); f32 accumulation.
        # TODO(synk): in production, cast at the data source so this isn't an
        # extra HBM pass over x; here it is a no-op if x is already bf16.
        if xp.dtype != jnp.bfloat16:
            xp = xp.astype(jnp.bfloat16)
        w1p = w1p.astype(jnp.bfloat16)
        w2p = w2p.astype(jnp.bfloat16)
    # Biases stay f32 (added to the f32 accumulator).

    out = pl.pallas_call(
        mlp_kernel,
        out_shape=jax.ShapeDtypeStruct((B, n_cls), jnp.float32),
        grid=(grid_m,),
        in_specs=[
            pl.BlockSpec((TM, in_f), lambda i: (i, 0)),        # x tile, pipelined
            pl.BlockSpec((in_f, hid_p), lambda i: (0, 0)),     # w1 resident
            pl.BlockSpec((1, hid_p), lambda i: (0, 0)),        # b1 resident
            pl.BlockSpec((hid_p, n_cls), lambda i: (0, 0)),    # w2 resident
            pl.BlockSpec((1, n_cls), lambda i: (0, 0)),        # b2 resident
        ],
        out_specs=pl.BlockSpec((TM, n_cls), lambda i: (i, 0)),  # true-width out
        compiler_params=pltpu.CompilerParams(
            dimension_semantics=("parallel",)),                 # megacore batch split
    )(xp, w1p, b1p, w2p, b2p)

    return out


def init_params(key):
    # Deterministic init mimicking nn.Linear's uniform(-1/sqrt(fan_in), 1/sqrt(fan_in)).
    k1, k2, k3, k4 = jax.random.split(key, 4)
    bound1 = 1.0 / (input_size ** 0.5)
    bound2 = 1.0 / (hidden_size ** 0.5)
    w1 = jax.random.uniform(k1, (input_size, hidden_size), jnp.float32,
                            minval=-bound1, maxval=bound1)
    b1 = jax.random.uniform(k2, (hidden_size,), jnp.float32,
                            minval=-bound1, maxval=bound1)
    w2 = jax.random.uniform(k3, (hidden_size, num_classes), jnp.float32,
                            minval=-bound2, maxval=bound2)
    b2 = jax.random.uniform(k4, (num_classes,), jnp.float32,
                            minval=-bound2, maxval=bound2)
    return w1, b1, w2, b2


if __name__ == "__main__":
    key = jax.random.PRNGKey(0)
    kx, kp = jax.random.split(key)
    batch = 8
    x = jax.random.normal(kx, (batch, input_size), jnp.float32)
    w1, b1, w2, b2 = init_params(kp)

    # Reference: plain JAX, same math as nn.Linear/ReLU/Linear.
    ref = jnp.maximum(x @ w1 + b1, 0.0) @ w2 + b2

    # f32 path: exact semantics, tight tolerance.
    out_f32 = jax.block_until_ready(mlp_forward(x, w1, b1, w2, b2, use_bf16=False))
    assert out_f32.shape == (batch, num_classes)
    assert jnp.allclose(out_f32, ref, atol=1e-4, rtol=1e-4)

    # Default (bf16 matmul inputs, f32 accumulation): loose tolerance vs f32 ref.
    out = jax.block_until_ready(mlp_forward(x, w1, b1, w2, b2))
    assert out.shape == (batch, num_classes)
    assert jnp.allclose(out, ref, atol=5e-2, rtol=5e-2)

    print("KERNEL_OK")
</pallas_src>

<mosaic_0001>
module attributes {stable_mosaic.version = 11 : i64} {
  func.func @mlp_kernel(%arg0: i32, %arg1: memref<8x256xf32, #tpu.memory_space<vmem>>, %arg2: memref<256x512xf32, #tpu.memory_space<vmem>>, %arg3: memref<1x512xf32, #tpu.memory_space<vmem>>, %arg4: memref<512x4xf32, #tpu.memory_space<vmem>>, %arg5: memref<1x4xf32, #tpu.memory_space<vmem>>, %arg6: memref<8x4xf32, #tpu.memory_space<vmem>>) attributes {dimension_semantics = [#tpu.dimension_semantics<parallel>], iteration_bounds = array<i64: 1>, scalar_prefetch = 0 : i64, scratch_operands = 0 : i64, tpu.core_type = #tpu.core_type<tc>, window_params = [{transform_indices = @transform_0, window_bounds = array<i64: 8, 256>}, {pipeline_mode = #tpu.pipeline_mode<synchronous>, transform_indices = @transform_1, window_bounds = array<i64: 256, 512>}, {pipeline_mode = #tpu.pipeline_mode<synchronous>, transform_indices = @transform_2, window_bounds = array<i64: 1, 512>}, {pipeline_mode = #tpu.pipeline_mode<synchronous>, transform_indices = @transform_3, window_bounds = array<i64: 512, 4>}, {pipeline_mode = #tpu.pipeline_mode<synchronous>, transform_indices = @transform_4, window_bounds = array<i64: 1, 4>}, {transform_indices = @transform_5, window_bounds = array<i64: 8, 4>}]} {
    %c0 = arith.constant 0 : index
    %c0_0 = arith.constant 0 : index
    %0 = vector.load %arg1[%c0, %c0_0] : memref<8x256xf32, #tpu.memory_space<vmem>>, vector<8x256xf32>
    %c0_1 = arith.constant 0 : index
    %c0_2 = arith.constant 0 : index
    %1 = vector.load %arg2[%c0_1, %c0_2] : memref<256x512xf32, #tpu.memory_space<vmem>>, vector<256x512xf32>
    %cst = arith.constant dense<0.000000e+00> : vector<8x512xf32>
    %2 = tpu.matmul %0, %1, %cst {dimension_numbers = #tpu.dot_dimension_numbers<[1], [0], [0], [1], [0, 0, 1, 1], [], []>} : vector<8x256xf32>, vector<256x512xf32>, vector<8x512xf32> -> vector<8x512xf32>
    %c0_3 = arith.constant 0 : index
    %c0_4 = arith.constant 0 : index
    %3 = vector.load %arg3[%c0_3, %c0_4] : memref<1x512xf32, #tpu.memory_space<vmem>>, vector<1x512xf32>
    %4 = vector.broadcast %3 : vector<1x512xf32> to vector<8x512xf32>
    %5 = arith.addf %2, %4 : vector<8x512xf32>
    %cst_5 = arith.constant 0.000000e+00 : f32
    %6 = vector.broadcast %cst_5 : f32 to vector<8x512xf32>
    %7 = arith.maximumf %5, %6 : vector<8x512xf32>
    %c0_6 = arith.constant 0 : index
    %c0_7 = arith.constant 0 : index
    %8 = vector.load %arg4[%c0_6, %c0_7] : memref<512x4xf32, #tpu.memory_space<vmem>>, vector<512x4xf32>
    %cst_8 = arith.constant dense<0.000000e+00> : vector<8x4xf32>
    %9 = tpu.matmul %7, %8, %cst_8 {dimension_numbers = #tpu.dot_dimension_numbers<[1], [0], [0], [1], [0, 0, 1, 1], [], []>} : vector<8x512xf32>, vector<512x4xf32>, vector<8x4xf32> -> vector<8x4xf32>
    %c0_9 = arith.constant 0 : index
    %c0_10 = arith.constant 0 : index
    %10 = vector.load %arg5[%c0_9, %c0_10] : memref<1x4xf32, #tpu.memory_space<vmem>>, vector<1x4xf32>
    %11 = vector.broadcast %10 : vector<1x4xf32> to vector<8x4xf32>
    %12 = arith.addf %9, %11 : vector<8x4xf32>
    %c0_11 = arith.constant 0 : index
    %c0_12 = arith.constant 0 : index
    %13 = vector.load %arg6[%c0_11, %c0_12] : memref<8x4xf32, #tpu.memory_space<vmem>>, vector<8x4xf32>
    tpu.vector_store %arg6[%c0_11, %c0_12], %12 {strides = array<i32>} : memref<8x4xf32, #tpu.memory_space<vmem>>, vector<8x4xf32>,
    return
  }
  func.func @transform_0(%arg0: i32) -> (i32, i32) {
    %c0_i32 = arith.constant 0 : i32
    %c0_i32_0 = arith.constant 0 : i32
    return %arg0, %c0_i32 : i32, i32
  }
  func.func @transform_1(%arg0: i32) -> (i32, i32) {
    %c0_i32 = arith.constant 0 : i32
    %c0_i32_0 = arith.constant 0 : i32
    %c0_i32_1 = arith.constant 0 : i32
    return %c0_i32, %c0_i32_0 : i32, i32
  }
  func.func @transform_2(%arg0: i32) -> (i32, i32) {
    %c0_i32 = arith.constant 0 : i32
    %c0_i32_0 = arith.constant 0 : i32
    %c0_i32_1 = arith.constant 0 : i32
    return %c0_i32, %c0_i32_0 : i32, i32
  }
  func.func @transform_3(%arg0: i32) -> (i32, i32) {
    %c0_i32 = arith.constant 0 : i32
    %c0_i32_0 = arith.constant 0 : i32
    %c0_i32_1 = arith.constant 0 : i32
    return %c0_i32, %c0_i32_0 : i32, i32
  }
  func.func @transform_4(%arg0: i32) -> (i32, i32) {
    %c0_i32 = arith.constant 0 : i32
    %c0_i32_0 = arith.constant 0 : i32
    %c0_i32_1 = arith.constant 0 : i32
    return %c0_i32, %c0_i32_0 : i32, i32
  }
  func.func @transform_5(%arg0: i32) -> (i32, i32) {
    %c0_i32 = arith.constant 0 : i32
    %c0_i32_0 = arith.constant 0 : i32
    return %arg0, %c0_i32 : i32, i32
  }
}

</mosaic_0001>

<bundles_post_ra>
// kernel: tpu_custom_call.1
= control target key start
LH: loop header
LB: loop body
LE: loop exit
PB: predicated region body
PF: predicated region fallthrough
CT: control target
= control target key end

     0   :  { %10 = vsyncpa [#allocation3], 0  ;;  %s525_s21 = smov [#allocation2]   ;;  %s526_s23 = smov 512   ;;  %s768_s0 = inlined_call_operand.vmem [shape: f32[8,256], index: 0, kind: input, shape index: {}]   ;;  %s769_s1 = inlined_call_operand.hbm [shape: f32[256,512], index: 1, kind: input, shape index: {}]   ;;  %s770_s2 = inlined_call_operand.vmem [shape: f32[1,512], index: 2, kind: input, shape index: {}]   ;;  %s771_s3 = inlined_call_operand.vmem [shape: f32[512,4], index: 3, kind: input, shape index: {}]   ;;  %s772_s4 = inlined_call_operand.vmem [shape: f32[1,4], index: 4, kind: input, shape index: {}]   ;;  %s773_s5 = inlined_call_operand.vmem [shape: f32[8,4], index: 5, kind: output, shape index: {}]  }
   0x1   :  { %s17_s20 = sshll.u32 %s769_s1, 4  ;;  %s19_s22 = sshll.u32 %s525_s21, 4  ;;  %s18_s20 = int_to_ptr.hbm [resolvable:$true] %s17_s20  ;;  %s20_s22 = int_to_ptr.vmem [resolvable:$true] %s19_s22 }
   0x2   :  { %s527_s24 = smov 32  }
   0x3   :  { %25 = dma.hbm_to_vmem [thread:$0]  %s18_s20, 16384, %s20_s22, [#allocation3], %s526_s23, %s526_s23, %s527_s24  }
   0x4   :  { %523 = dma.done.wait [#allocation3], 16384  }
   0x5   :  { %524 = vsyncadd [#allocation3], 4294950912  ;;  %v98_v0 = vld [vmem:[#allocation2 + $0x1e0] sm:$0xff]  ;;  %v99_v1 = vld [vmem:[#allocation2 + $0x1e8] sm:$0xff]  ;;  %vm488_vm0 = vcmask 31744  }
   0x6   :  { %v94_v2 = vld [vmem:[#allocation2 + $0x1c0] sm:$0xff]  ;;  %176 = vmatpush.msra.mxu0 %v98_v0  ;;  %216 = vmatpush.msra.mxu2 %v99_v1  ;;  %v95_v4 = vld [vmem:[#allocation2 + $0x1c8] sm:$0xff]  ;;  %v100_v62 = vld [vmem:[#allocation2 + $0x1f0] sm:$0xff] }
   0x7   :  { %v162_v3 = vld [vmem:[#allocation2 + $0x3e0] sm:$0xff]  ;;  %v163_v5 = vld [vmem:[#allocation2 + $0x3e8] sm:$0xff]  ;;  %v101_v63 = vld [vmem:[#allocation2 + $0x1f8] sm:$0xff] }
   0x8   :  { %196 = vmatpush.msra.mxu1 %v162_v3  ;;  %236 = vmatpush.msra.mxu3 %v163_v5  ;;  %v90_v6 = vld [vmem:[#allocation2 + $0x1a0] sm:$0xff]  ;;  %v91_v8 = vld [vmem:[#allocation2 + $0x1a8] sm:$0xff]  ;;  %v164_v3 = vld [vmem:[#allocation2 + $0x3f0] sm:$0xff] }
   0x9   :  { %v158_v7 = vld [vmem:[#allocation2 + $0x3c0] sm:$0xff]  ;;  %177 = vmatpush.msra.mxu0 %v94_v2  ;;  %217 = vmatpush.msra.mxu2 %v95_v4  ;;  %v159_v9 = vld [vmem:[#allocation2 + $0x3c8] sm:$0xff]  ;;  %v96_v2 = vld [vmem:[#allocation2 + $0x1d0] sm:$0xff] }
   0xa   :  { %v154_v10 = vld [vmem:[#allocation2 + $0x3a0] sm:$0xff]  ;;  %197 = vmatpush.msra.mxu1 %v158_v7  ;;  %237 = vmatpush.msra.mxu3 %v159_v9  ;;  %v87_v12 = vld [vmem:[#allocation2 + $0x188] sm:$0xff]  ;;  %v97_v4 = vld [vmem:[#allocation2 + $0x1d8] sm:$0xff] }
   0xb   :  { %v86_v11 = vld [vmem:[#allocation2 + $0x180] sm:$0xff]  ;;  %v155_v13 = vld [vmem:[#allocation2 + $0x3a8] sm:$0xff]  ;;  %178 = vmatpush.msra.mxu0 %v90_v6  ;;  %218 = vmatpush.msra.mxu2 %v91_v8  ;;  %v165_v5 = vld [vmem:[#allocation2 + $0x3f8] sm:$0xff] }
   0xc   :  { %v150_v14 = vld [vmem:[#allocation2 + $0x380] sm:$0xff]  ;;  %v151_v15 = vld [vmem:[#allocation2 + $0x388] sm:$0xff]  ;;  %198 = vmatpush.msra.mxu1 %v154_v10  ;;  %238 = vmatpush.msra.mxu3 %v155_v13  ;;  %v92_v6 = vld [vmem:[#allocation2 + $0x1b0] sm:$0xff] }
   0xd   :  { %v82_v16 = vld [vmem:[#allocation2 + $0x160] sm:$0xff]  ;;  %v83_v17 = vld [vmem:[#allocation2 + $0x168] sm:$0xff]  ;;  %179 = vmatpush.msra.mxu0 %v86_v11  ;;  %219 = vmatpush.msra.mxu2 %v87_v12  ;;  %v160_v7 = vld [vmem:[#allocation2 + $0x3d0] sm:$0xff] }
   0xe   :  { %v146_v18 = vld [vmem:[#allocation2 + $0x360] sm:$0xff]  ;;  %v147_v19 = vld [vmem:[#allocation2 + $0x368] sm:$0xff]  ;;  %199 = vmatpush.msra.mxu1 %v150_v14  ;;  %239 = vmatpush.msra.mxu3 %v151_v15  ;;  %v93_v8 = vld [vmem:[#allocation2 + $0x1b8] sm:$0xff] }
   0xf   :  { %v78_v20 = vld [vmem:[#allocation2 + $0x140] sm:$0xff]  ;;  %v79_v21 = vld [vmem:[#allocation2 + $0x148] sm:$0xff]  ;;  %180 = vmatpush.msra.mxu0 %v82_v16  ;;  %220 = vmatpush.msra.mxu2 %v83_v17  ;;  %v161_v9 = vld [vmem:[#allocation2 + $0x3d8] sm:$0xff] }
  0x10   :  { %v142_v22 = vld [vmem:[#allocation2 + $0x340] sm:$0xff]  ;;  %v143_v23 = vld [vmem:[#allocation2 + $0x348] sm:$0xff]  ;;  %200 = vmatpush.msra.mxu1 %v146_v18  ;;  %240 = vmatpush.msra.mxu3 %v147_v19  ;;  %v88_v10 = vld [vmem:[#allocation2 + $0x190] sm:$0xff] }
  0x11   :  { %v74_v24 = vld [vmem:[#allocation2 + $0x120] sm:$0xff]  ;;  %v75_v25 = vld [vmem:[#allocation2 + $0x128] sm:$0xff]  ;;  %181 = vmatpush.msra.mxu0 %v78_v20  ;;  %221 = vmatpush.msra.mxu2 %v79_v21  ;;  %v156_v11 = vld [vmem:[#allocation2 + $0x3b0] sm:$0xff] }
  0x12   :  { %v138_v26 = vld [vmem:[#allocation2 + $0x320] sm:$0xff]  ;;  %v139_v27 = vld [vmem:[#allocation2 + $0x328] sm:$0xff]  ;;  %201 = vmatpush.msra.mxu1 %v142_v22  ;;  %241 = vmatpush.msra.mxu3 %v143_v23  ;;  %v89_v12 = vld [vmem:[#allocation2 + $0x198] sm:$0xff] }
  0x13   :  { %v70_v28 = vld [vmem:[#allocation2 + $0x100] sm:$0xff]  ;;  %v71_v29 = vld [vmem:[#allocation2 + $0x108] sm:$0xff]  ;;  %182 = vmatpush.msra.mxu0 %v74_v24  ;;  %222 = vmatpush.msra.mxu2 %v75_v25  ;;  %v157_v13 = vld [vmem:[#allocation2 + $0x3b8] sm:$0xff] }
  0x14   :  { %v134_v30 = vld [vmem:[#allocation2 + $0x300] sm:$0xff]  ;;  %v135_v31 = vld [vmem:[#allocation2 + $0x308] sm:$0xff]  ;;  %202 = vmatpush.msra.mxu1 %v138_v26  ;;  %242 = vmatpush.msra.mxu3 %v139_v27  ;;  %v84_v14 = vld [vmem:[#allocation2 + $0x170] sm:$0xff] }
  0x15   :  { %v66_v32 = vld [vmem:[#allocation2 + $0xe0] sm:$0xff]  ;;  %v67_v33 = vld [vmem:[#allocation2 + $0xe8] sm:$0xff]  ;;  %183 = vmatpush.msra.mxu0 %v70_v28  ;;  %223 = vmatpush.msra.mxu2 %v71_v29  ;;  %v152_v15 = vld [vmem:[#allocation2 + $0x390] sm:$0xff] }
  0x16   :  { %v130_v34 = vld [vmem:[#allocation2 + $0x2e0] sm:$0xff]  ;;  %v131_v35 = vld [vmem:[#allocation2 + $0x2e8] sm:$0xff]  ;;  %203 = vmatpush.msra.mxu1 %v134_v30  ;;  %243 = vmatpush.msra.mxu3 %v135_v31  ;;  %v85_v16 = vld [vmem:[#allocation2 + $0x178] sm:$0xff] }
  0x17   :  { %v62_v36 = vld [vmem:[#allocation2 + $0xc0] sm:$0xff]  ;;  %v63_v37 = vld [vmem:[#allocation2 + $0xc8] sm:$0xff]  ;;  %184 = vmatpush.msra.mxu0 %v66_v32  ;;  %224 = vmatpush.msra.mxu2 %v67_v33  ;;  %v153_v17 = vld [vmem:[#allocation2 + $0x398] sm:$0xff] }
  0x18   :  { %v126_v38 = vld [vmem:[#allocation2 + $0x2c0] sm:$0xff]  ;;  %v127_v39 = vld [vmem:[#allocation2 + $0x2c8] sm:$0xff]  ;;  %204 = vmatpush.msra.mxu1 %v130_v34  ;;  %244 = vmatpush.msra.mxu3 %v131_v35  ;;  %v80_v18 = vld [vmem:[#allocation2 + $0x150] sm:$0xff] }
  0x19   :  { %v58_v40 = vld [vmem:[#allocation2 + $0xa0] sm:$0xff]  ;;  %v59_v41 = vld [vmem:[#allocation2 + $0xa8] sm:$0xff]  ;;  %185 = vmatpush.msra.mxu0 %v62_v36  ;;  %225 = vmatpush.msra.mxu2 %v63_v37  ;;  %v148_v19 = vld [vmem:[#allocation2 + $0x370] sm:$0xff] }
  0x1a   :  { %v122_v42 = vld [vmem:[#allocation2 + $0x2a0] sm:$0xff]  ;;  %v123_v43 = vld [vmem:[#allocation2 + $0x2a8] sm:$0xff]  ;;  %205 = vmatpush.msra.mxu1 %v126_v38  ;;  %245 = vmatpush.msra.mxu3 %v127_v39  ;;  %v81_v20 = vld [vmem:[#allocation2 + $0x158] sm:$0xff] }
  0x1b   :  { %v54_v44 = vld [vmem:[#allocation2 + $0x80] sm:$0xff]  ;;  %v55_v45 = vld [vmem:[#allocation2 + $0x88] sm:$0xff]  ;;  %186 = vmatpush.msra.mxu0 %v58_v40  ;;  %226 = vmatpush.msra.mxu2 %v59_v41  ;;  %v149_v21 = vld [vmem:[#allocation2 + $0x378] sm:$0xff] }
  0x1c   :  { %v118_v46 = vld [vmem:[#allocation2 + $0x280] sm:$0xff]  ;;  %v119_v47 = vld [vmem:[#allocation2 + $0x288] sm:$0xff]  ;;  %206 = vmatpush.msra.mxu1 %v122_v42  ;;  %246 = vmatpush.msra.mxu3 %v123_v43  ;;  %v76_v22 = vld [vmem:[#allocation2 + $0x130] sm:$0xff] }
  0x1d   :  { %v50_v48 = vld [vmem:[#allocation2 + $0x60] sm:$0xff]  ;;  %v51_v49 = vld [vmem:[#allocation2 + $0x68] sm:$0xff]  ;;  %187 = vmatpush.msra.mxu0 %v54_v44  ;;  %227 = vmatpush.msra.mxu2 %v55_v45  ;;  %v144_v23 = vld [vmem:[#allocation2 + $0x350] sm:$0xff] }
  0x1e   :  { %v114_v50 = vld [vmem:[#allocation2 + $0x260] sm:$0xff]  ;;  %v115_v51 = vld [vmem:[#allocation2 + $0x268] sm:$0xff]  ;;  %207 = vmatpush.msra.mxu1 %v118_v46  ;;  %247 = vmatpush.msra.mxu3 %v119_v47  ;;  %v77_v24 = vld [vmem:[#allocation2 + $0x138] sm:$0xff] }
  0x1f   :  { %v46_v52 = vld [vmem:[#allocation2 + $0x40] sm:$0xff]  ;;  %v47_v53 = vld [vmem:[#allocation2 + $0x48] sm:$0xff]  ;;  %188 = vmatpush.msra.mxu0 %v50_v48  ;;  %228 = vmatpush.msra.mxu2 %v51_v49  ;;  %v145_v25 = vld [vmem:[#allocation2 + $0x358] sm:$0xff] }
  0x20   :  { %v110_v54 = vld [vmem:[#allocation2 + $0x240] sm:$0xff]  ;;  %v111_v55 = vld [vmem:[#allocation2 + $0x248] sm:$0xff]  ;;  %208 = vmatpush.msra.mxu1 %v114_v50  ;;  %248 = vmatpush.msra.mxu3 %v115_v51  ;;  %v72_v26 = vld [vmem:[#allocation2 + $0x110] sm:$0xff] }
  0x21   :  { %v42_v56 = vld [vmem:[#allocation2 + $0x20] sm:$0xff]  ;;  %v43_v57 = vld [vmem:[#allocation2 + $0x28] sm:$0xff]  ;;  %189 = vmatpush.msra.mxu0 %v46_v52  ;;  %229 = vmatpush.msra.mxu2 %v47_v53  ;;  %v140_v27 = vld [vmem:[#allocation2 + $0x330] sm:$0xff] }
  0x22   :  { %v106_v58 = vld [vmem:[#allocation2 + $0x220] sm:$0xff]  ;;  %v107_v59 = vld [vmem:[#allocation2 + $0x228] sm:$0xff]  ;;  %209 = vmatpush.msra.mxu1 %v110_v54  ;;  %249 = vmatpush.msra.mxu3 %v111_v55  ;;  %v73_v28 = vld [vmem:[#allocation2 + $0x118] sm:$0xff] }
  0x23   :  { %v38_v60 = vld [vmem:[#allocation2] sm:$0xff]  ;;  %v39_v61 = vld [vmem:[#allocation2 + $0x8] sm:$0xff]  ;;  %190 = vmatpush.msra.mxu0 %v42_v56  ;;  %230 = vmatpush.msra.mxu2 %v43_v57  ;;  %v141_v29 = vld [vmem:[#allocation2 + $0x338] sm:$0xff] }
  0x24   :  { %210 = vmatpush.msra.mxu1 %v106_v58  ;;  %250 = vmatpush.msra.mxu3 %v107_v59  ;;  %v102_v0 = vld [vmem:[#allocation2 + $0x200] sm:$0xff]  ;;  %v103_v1 = vld [vmem:[#allocation2 + $0x208] sm:$0xff]  ;;  %v68_v30 = vld [vmem:[#allocation2 + $0xf0] sm:$0xff] }
  0x25   :  { %191 = vmatpush.msra.mxu0 %v38_v60  ;;  %231 = vmatpush.msra.mxu2 %v39_v61  ;;  %v136_v31 = vld [vmem:[#allocation2 + $0x310] sm:$0xff]  ;;  %v69_v32 = vld [vmem:[#allocation2 + $0xf8] sm:$0xff]  ;;  %v36_v46 = vld [vmem:[%s768_s0] sm:$0xff] }
  0x26   :  { %211 = vmatpush.msra.mxu1 %v102_v0  ;;  %251 = vmatpush.msra.mxu3 %v103_v1  ;;  %v137_v33 = vld [vmem:[#allocation2 + $0x318] sm:$0xff]  ;;  %v64_v34 = vld [vmem:[#allocation2 + $0xd0] sm:$0xff]  ;;  %v37_v51 = vld [vmem:[%s768_s0 + $0x8] sm:$0xff] }
  0x27   :  { %256 = vmatpush.msrb.mxu0 %v100_v62  ;;  %296 = vmatpush.msrb.mxu2 %v101_v63  ;;  %v132_v35 = vld [vmem:[#allocation2 + $0x2f0] sm:$0xff]  ;;  %v65_v36 = vld [vmem:[#allocation2 + $0xd8] sm:$0xff] }
  0x28   :  { %276 = vmatpush.msrb.mxu1 %v164_v3  ;;  %316 = vmatpush.msrb.mxu3 %v165_v5  ;;  %v133_v37 = vld [vmem:[#allocation2 + $0x2f8] sm:$0xff]  ;;  %v60_v38 = vld [vmem:[#allocation2 + $0xb0] sm:$0xff] }
  0x29   :  { %257 = vmatpush.msrb.mxu0 %v96_v2  ;;  %297 = vmatpush.msrb.mxu2 %v97_v4  ;;  %v128_v39 = vld [vmem:[#allocation2 + $0x2d0] sm:$0xff]  ;;  %v61_v40 = vld [vmem:[#allocation2 + $0xb8] sm:$0xff] }
  0x2a   :  { %277 = vmatpush.msrb.mxu1 %v160_v7  ;;  %317 = vmatpush.msrb.mxu3 %v161_v9  ;;  %v129_v41 = vld [vmem:[#allocation2 + $0x2d8] sm:$0xff]  ;;  %v56_v42 = vld [vmem:[#allocation2 + $0x90] sm:$0xff] }
  0x2b   :  { %258 = vmatpush.msrb.mxu0 %v92_v6  ;;  %298 = vmatpush.msrb.mxu2 %v93_v8  ;;  %v124_v43 = vld [vmem:[#allocation2 + $0x2b0] sm:$0xff]  ;;  %v57_v44 = vld [vmem:[#allocation2 + $0x98] sm:$0xff] }
  0x2c   :  { %278 = vmatpush.msrb.mxu1 %v156_v11  ;;  %318 = vmatpush.msrb.mxu3 %v157_v13  ;;  %v125_v45 = vld [vmem:[#allocation2 + $0x2b8] sm:$0xff]  ;;  %v52_v47 = vld [vmem:[#allocation2 + $0x70] sm:$0xff]  ;;  %v369_v11 = vld [vmem:[%s771_s3 + $0xe8] sm:$0xff] }
  0x2d   :  { %259 = vmatpush.msrb.mxu0 %v88_v10  ;;  %299 = vmatpush.msrb.mxu2 %v89_v12  ;;  %v120_v48 = vld [vmem:[#allocation2 + $0x290] sm:$0xff]  ;;  %v53_v49 = vld [vmem:[#allocation2 + $0x78] sm:$0xff]  ;;  %v353_v10 = vld [vmem:[%s771_s3 + $0x68] sm:$0xff] }
  0x2e   :  { %279 = vmatpush.msrb.mxu1 %v152_v15  ;;  %319 = vmatpush.msrb.mxu3 %v153_v17  ;;  %v121_v50 = vld [vmem:[#allocation2 + $0x298] sm:$0xff]  ;;  %v48_v52 = vld [vmem:[#allocation2 + $0x50] sm:$0xff]  ;;  %v385_v12 = vld [vmem:[%s771_s3 + $0x168] sm:$0xff] }
  0x2f   :  { %260 = vmatpush.msrb.mxu0 %v84_v14  ;;  %300 = vmatpush.msrb.mxu2 %v85_v16  ;;  %v116_v53 = vld [vmem:[#allocation2 + $0x270] sm:$0xff]  ;;  %v49_v54 = vld [vmem:[#allocation2 + $0x58] sm:$0xff]  ;;  %v401_v13 = vld [vmem:[%s771_s3 + $0x1e8] sm:$0xff] }
  0x30   :  { %280 = vmatpush.msrb.mxu1 %v148_v19  ;;  %320 = vmatpush.msrb.mxu3 %v149_v21  ;;  %v117_v55 = vld [vmem:[#allocation2 + $0x278] sm:$0xff]  ;;  %v44_v56 = vld [vmem:[#allocation2 + $0x30] sm:$0xff]  ;;  %v352_v14 = vld [vmem:[%s771_s3 + $0x60] sm:$0xff] }
  0x31   :  { %261 = vmatpush.msrb.mxu0 %v80_v18  ;;  %301 = vmatpush.msrb.mxu2 %v81_v20  ;;  %v112_v57 = vld [vmem:[#allocation2 + $0x250] sm:$0xff]  ;;  %v45_v58 = vld [vmem:[#allocation2 + $0x38] sm:$0xff]  ;;  %v368_v15 = vld [vmem:[%s771_s3 + $0xe0] sm:$0xff] }
  0x32   :  { %281 = vmatpush.msrb.mxu1 %v144_v23  ;;  %321 = vmatpush.msrb.mxu3 %v145_v25  ;;  %v113_v59 = vld [vmem:[#allocation2 + $0x258] sm:$0xff]  ;;  %v40_v60 = vld [vmem:[#allocation2 + $0x10] sm:$0xff]  ;;  %v384_v16 = vld [vmem:[%s771_s3 + $0x160] sm:$0xff] }
  0x33   :  { %262 = vmatpush.msrb.mxu0 %v76_v22  ;;  %302 = vmatpush.msrb.mxu2 %v77_v24  ;;  %v108_v61 = vld [vmem:[#allocation2 + $0x230] sm:$0xff]  ;;  %v41_v62 = vld [vmem:[#allocation2 + $0x18] sm:$0xff]  ;;  %v400_v17 = vld [vmem:[%s771_s3 + $0x1e0] sm:$0xff] }
  0x34   :  { %282 = vmatpush.msrb.mxu1 %v140_v27  ;;  %322 = vmatpush.msrb.mxu3 %v141_v29  ;;  %v109_v63 = vld [vmem:[#allocation2 + $0x238] sm:$0xff]  ;;  %v104_v0 = vld [vmem:[#allocation2 + $0x210] sm:$0xff]  ;;  %v349_v25 = vld [vmem:[%s771_s3 + $0x48] sm:$0xff] }
  0x35   :  { %263 = vmatpush.msrb.mxu0 %v72_v26  ;;  %303 = vmatpush.msrb.mxu2 %v73_v28  ;;  %v105_v1 = vld [vmem:[#allocation2 + $0x218] sm:$0xff]  ;;  %v354_v6 = vld [vmem:[%s771_s3 + $0x70] sm:$0xff]  ;;  %v365_v26 = vld [vmem:[%s771_s3 + $0xc8] sm:$0xff] }
  0x36   :  { %283 = vmatpush.msrb.mxu1 %v136_v31  ;;  %323 = vmatpush.msrb.mxu3 %v137_v33  ;;  %v355_v2 = vld [vmem:[%s771_s3 + $0x78] sm:$0xff]  ;;  %v370_v7 = vld [vmem:[%s771_s3 + $0xf0] sm:$0xff]  ;;  %v381_v27 = vld [vmem:[%s771_s3 + $0x148] sm:$0xff] }
  0x37   :  { %264 = vmatpush.msrb.mxu0 %v68_v30  ;;  %304 = vmatpush.msrb.mxu2 %v69_v32  ;;  %v371_v3 = vld [vmem:[%s771_s3 + $0xf8] sm:$0xff]  ;;  %v386_v8 = vld [vmem:[%s771_s3 + $0x170] sm:$0xff]  ;;  %v348_v28 = vld [vmem:[%s771_s3 + $0x40] sm:$0xff] }
  0x38   :  { %284 = vmatpush.msrb.mxu1 %v132_v35  ;;  %324 = vmatpush.msrb.mxu3 %v133_v37  ;;  %v387_v4 = vld [vmem:[%s771_s3 + $0x178] sm:$0xff]  ;;  %v402_v9 = vld [vmem:[%s771_s3 + $0x1f0] sm:$0xff]  ;;  %v364_v29 = vld [vmem:[%s771_s3 + $0xc0] sm:$0xff] }
  0x39   :  { %265 = vmatpush.msrb.mxu0 %v64_v34  ;;  %305 = vmatpush.msrb.mxu2 %v65_v36  ;;  %v403_v5 = vld [vmem:[%s771_s3 + $0x1f8] sm:$0xff]  ;;  %v350_v22 = vld [vmem:[%s771_s3 + $0x50] sm:$0xff]  ;;  %v380_v30 = vld [vmem:[%s771_s3 + $0x140] sm:$0xff] }
  0x3a   :  { %285 = vmatpush.msrb.mxu1 %v128_v39  ;;  %325 = vmatpush.msrb.mxu3 %v129_v41  ;;  %v351_v18 = vld [vmem:[%s771_s3 + $0x58] sm:$0xff]  ;;  %v366_v23 = vld [vmem:[%s771_s3 + $0xd0] sm:$0xff]  ;;  %v345_v34 = vld [vmem:[%s771_s3 + $0x28] sm:$0xff] }
  0x3b   :  { %266 = vmatpush.msrb.mxu0 %v60_v38  ;;  %306 = vmatpush.msrb.mxu2 %v61_v40  ;;  %v367_v19 = vld [vmem:[%s771_s3 + $0xd8] sm:$0xff]  ;;  %v382_v24 = vld [vmem:[%s771_s3 + $0x150] sm:$0xff]  ;;  %v344_v38 = vld [vmem:[%s771_s3 + $0x20] sm:$0xff] }
  0x3c   :  { %286 = vmatpush.msrb.mxu1 %v124_v43  ;;  %326 = vmatpush.msrb.mxu3 %v125_v45  ;;  %v383_v20 = vld [vmem:[%s771_s3 + $0x158] sm:$0xff]  ;;  %v346_v33 = vld [vmem:[%s771_s3 + $0x30] sm:$0xff]  ;;  %v361_v39 = vld [vmem:[%s771_s3 + $0xa8] sm:$0xff] }
  0x3d   :  { %267 = vmatpush.msrb.mxu0 %v56_v42  ;;  %307 = vmatpush.msrb.mxu2 %v57_v44  ;;  %v399_v21 = vld [vmem:[%s771_s3 + $0x1d8] sm:$0xff]  ;;  %v362_v35 = vld [vmem:[%s771_s3 + $0xb0] sm:$0xff]  ;;  %v397_v41 = vld [vmem:[%s771_s3 + $0x1c8] sm:$0xff] }
  0x3e   :  { %192 = vmatmul.f32.vlgmr.msra.gmra.mxu0 %v36_v46  ;;  %232 = vmatmul.f32.vlgmr.msra.gmra.mxu2 %v36_v46  ;;  %v347_v31 = vld [vmem:[%s771_s3 + $0x38] sm:$0xff]  ;;  %v398_v37 = vld [vmem:[%s771_s3 + $0x1d0] sm:$0xff]  ;;  %v360_v43 = vld [vmem:[%s771_s3 + $0xa0] sm:$0xff] }
  0x3f   :  { %268 = vmatpush.msrb.mxu0 %v52_v47  ;;  %287 = vmatpush.msrb.mxu1 %v120_v48  ;;  %v363_v32 = vld [vmem:[%s771_s3 + $0xb8] sm:$0xff]  ;;  %v378_v40 = vld [vmem:[%s771_s3 + $0x130] sm:$0xff]  ;;  %v377_v44 = vld [vmem:[%s771_s3 + $0x128] sm:$0xff] }
  0x40   :  { %308 = vmatpush.msrb.mxu2 %v53_v49  ;;  %327 = vmatpush.msrb.mxu3 %v121_v50  ;;  %v379_v36 = vld [vmem:[%s771_s3 + $0x138] sm:$0xff]  ;;  %v396_v45 = vld [vmem:[%s771_s3 + $0x1c0] sm:$0xff]  ;;  %v341_v50 = vld [vmem:[%s771_s3 + $0x8] sm:$0xff] }
  0x41   :  { %212 = vmatmul.f32.vlgmr.msra.gmra.mxu1 %v37_v51  ;;  %252 = vmatmul.f32.vlgmr.msra.gmra.mxu3 %v37_v51  ;;  %v343_v42 = vld [vmem:[%s771_s3 + $0x18] sm:$0xff]  ;;  %v376_v48 = vld [vmem:[%s771_s3 + $0x120] sm:$0xff] }
  0x42   :  { %269 = vmatpush.msrb.mxu0 %v48_v52  ;;  %288 = vmatpush.msrb.mxu1 %v116_v53  ;;  %v359_v47 = vld [vmem:[%s771_s3 + $0x98] sm:$0xff]  ;;  %v394_v53 = vld [vmem:[%s771_s3 + $0x1b0] sm:$0xff] }
  0x43   :  { %309 = vmatpush.msrb.mxu2 %v49_v54  ;;  %328 = vmatpush.msrb.mxu3 %v117_v55  ;;  %v395_v49 = vld [vmem:[%s771_s3 + $0x1b8] sm:$0xff]  ;;  %v340_v54 = vld [vmem:[%s771_s3] sm:$0xff]  ;;  %v357_v55 = vld [vmem:[%s771_s3 + $0x88] sm:$0xff] }
  0x44   :  { %270 = vmatpush.msrb.mxu0 %v44_v56  ;;  %289 = vmatpush.msrb.mxu1 %v112_v57  ;;  %v375_v52 = vld [vmem:[%s771_s3 + $0x118] sm:$0xff]  ;;  %v374_v56 = vld [vmem:[%s771_s3 + $0x110] sm:$0xff]  ;;  %v393_v57 = vld [vmem:[%s771_s3 + $0x1a8] sm:$0xff] }
  0x45   :  { %310 = vmatpush.msrb.mxu2 %v45_v58  ;;  %329 = vmatpush.msrb.mxu3 %v113_v59  ;;  %v356_v58 = vld [vmem:[%s771_s3 + $0x80] sm:$0xff]  ;;  %v373_v59 = vld [vmem:[%s771_s3 + $0x108] sm:$0xff] }
  0x46   :  { %271 = vmatpush.msrb.mxu0 %v40_v60  ;;  %290 = vmatpush.msrb.mxu1 %v108_v61  ;;  %v392_v60 = vld [vmem:[%s771_s3 + $0x1a0] sm:$0xff] }
  0x47   :  { %311 = vmatpush.msrb.mxu2 %v41_v62  ;;  %330 = vmatpush.msrb.mxu3 %v109_v63  ;;  %v372_v61 = vld [vmem:[%s771_s3 + $0x100] sm:$0xff]  ;;  %v391_v62 = vld [vmem:[%s771_s3 + $0x198] sm:$0xff]  ;;  %v390_v63 = vld [vmem:[%s771_s3 + $0x190] sm:$0xff] }
  0x48   :  { %272 = vmatmul.f32.vlgmr.msrb.gmra.mxu0 %v36_v46  ;;  %312 = vmatmul.f32.vlgmr.msrb.gmra.mxu2 %v36_v46  ;;  %v342_v46 = vld [vmem:[%s771_s3 + $0x10] sm:$0xff] }
  0x49   :  { %291 = vmatpush.msrb.mxu1 %v104_v0  ;;  %331 = vmatpush.msrb.mxu3 %v105_v1  ;;  %v389_v0 = vld [vmem:[%s771_s3 + $0x188] sm:$0xff]  ;;  %v388_v1 = vld [vmem:[%s771_s3 + $0x180] sm:$0xff] }
  0x4a   :  { %292 = vmatmul.f32.vlgmr.msrb.gmra.mxu1 %v37_v51  ;;  %332 = vmatmul.f32.vlgmr.msrb.gmra.mxu3 %v37_v51  ;;  %v358_v51 = vld [vmem:[%s771_s3 + $0x90] sm:$0xff] }
  0x4b   :  { %408 = vmatpush.msra.mxu0 %v355_v2  ;;  %428 = vmatpush.msra.mxu1 %v371_v3  ;;  %v166_v2 = vld [vmem:[%s770_s2] sm:$0xf] }
  0x4c   :  { %448 = vmatpush.msra.mxu2 %v387_v4  ;;  %468 = vmatpush.msra.mxu3 %v403_v5  ;;  %v168_v3 = vperm.slane %v166_v2, 0 }
  0x4d   :  { %409 = vmatpush.msra.mxu0 %v354_v6  ;;  %429 = vmatpush.msra.mxu1 %v370_v7  ;;  %v169_v7 = vperm.slane %v166_v2, 1 }
  0x4e   :  { %449 = vmatpush.msra.mxu2 %v386_v8  ;;  %469 = vmatpush.msra.mxu3 %v402_v9 }
  0x4f   :  { %410 = vmatpush.msra.mxu0 %v353_v10  ;;  %430 = vmatpush.msra.mxu1 %v369_v11 }
  0x50   :  { %450 = vmatpush.msra.mxu2 %v385_v12  ;;  %470 = vmatpush.msra.mxu3 %v401_v13  ;;  %v170_v12 = vperm.slane %v166_v2, 2 }
  0x51   :  { %411 = vmatpush.msra.mxu0 %v352_v14  ;;  %431 = vmatpush.msra.mxu1 %v368_v15 }
  0x52   :  { %451 = vmatpush.msra.mxu2 %v384_v16  ;;  %471 = vmatpush.msra.mxu3 %v400_v17 }
  0x53   :  { %412 = vmatpush.msra.mxu0 %v351_v18  ;;  %432 = vmatpush.msra.mxu1 %v367_v19 }
  0x54   :  { %452 = vmatpush.msra.mxu2 %v383_v20  ;;  %472 = vmatpush.msra.mxu3 %v399_v21  ;;  %v171_v20 = vperm.slane %v166_v2, 3 }
  0x55   :  { %413 = vmatpush.msra.mxu0 %v350_v22  ;;  %433 = vmatpush.msra.mxu1 %v366_v23 }
  0x56   :  { %453 = vmatpush.msra.mxu2 %v382_v24  ;;  %473 = vmatpush.msra.mxu3 %v398_v37 }
  0x57   :  { %414 = vmatpush.msra.mxu0 %v349_v25  ;;  %434 = vmatpush.msra.mxu1 %v365_v26 }
  0x58   :  { %454 = vmatpush.msra.mxu2 %v381_v27  ;;  %474 = vmatpush.msra.mxu3 %v397_v41  ;;  %v498_v27 = vld [vmem:[%s772_s4] ss:$0 sm:$0xff] }
  0x59   :  { %415 = vmatpush.msra.mxu0 %v348_v28  ;;  %435 = vmatpush.msra.mxu1 %v364_v29 }
  0x5a   :  { %455 = vmatpush.msra.mxu2 %v380_v30  ;;  %475 = vmatpush.msra.mxu3 %v396_v45 }
  0x5b   :  { %416 = vmatpush.msra.mxu0 %v347_v31  ;;  %436 = vmatpush.msra.mxu1 %v363_v32 }
  0x5c   :  { %456 = vmatpush.msra.mxu2 %v379_v36  ;;  %476 = vmatpush.msra.mxu3 %v395_v49 }
  0x5d   :  { %417 = vmatpush.msra.mxu0 %v346_v33  ;;  %437 = vmatpush.msra.mxu1 %v362_v35 }
  0x5e   :  { %457 = vmatpush.msra.mxu2 %v378_v40  ;;  %477 = vmatpush.msra.mxu3 %v394_v53 }
  0x5f   :  { %418 = vmatpush.msra.mxu0 %v345_v34  ;;  %438 = vmatpush.msra.mxu1 %v361_v39 }
  0x60   :  { %458 = vmatpush.msra.mxu2 %v377_v44  ;;  %478 = vmatpush.msra.mxu3 %v393_v57 }
  0x61   :  { %419 = vmatpush.msra.mxu0 %v344_v38  ;;  %439 = vmatpush.msra.mxu1 %v360_v43 }
  0x62   :  { %459 = vmatpush.msra.mxu2 %v376_v48  ;;  %479 = vmatpush.msra.mxu3 %v392_v60 }
  0x63   :  { %420 = vmatpush.msra.mxu0 %v343_v42  ;;  %440 = vmatpush.msra.mxu1 %v359_v47 }
  0x64   :  { %460 = vmatpush.msra.mxu2 %v375_v52  ;;  %480 = vmatpush.msra.mxu3 %v391_v62 }
  0x65   :  { %421 = vmatpush.msra.mxu0 %v342_v46  ;;  %441 = vmatpush.msra.mxu1 %v358_v51 }
  0x66   :  { %461 = vmatpush.msra.mxu2 %v374_v56  ;;  %481 = vmatpush.msra.mxu3 %v390_v63 }
  0x67   :  { %422 = vmatpush.msra.mxu0 %v341_v50  ;;  %442 = vmatpush.msra.mxu1 %v357_v55 }
  0x68   :  { %462 = vmatpush.msra.mxu2 %v373_v59  ;;  %482 = vmatpush.msra.mxu3 %v389_v0 }
  0x69   :  { %423 = vmatpush.msra.mxu0 %v340_v54  ;;  %443 = vmatpush.msra.mxu1 %v356_v58 }
  0x6a   :  { %463 = vmatpush.msra.mxu2 %v372_v61  ;;  %483 = vmatpush.msra.mxu3 %v388_v1 }
  0xbb   :  { %v193_v4 = vpop.f32.mrf.mxu0 }
  0xbc   :  { %v194_v5 = vadd.f32 %v193_v4, %v168_v3 }
  0xbe   :  { %v213_v6 = vpop.f32.mrf.mxu1 }
  0xbf   :  { %v214_v8 = vadd.f32 %v213_v6, %v194_v5 }
  0xc1   :  { %v336_v9 = vmax.f32 %v214_v8, 0.0  ;;  %v233_v10 = vpop.f32.mrf.mxu2 }
  0xc2   :  { %v234_v11 = vadd.f32 %v233_v10, %v169_v7 }
  0xc3   :  { %424 = vmatmul.f32.vlgmr.msra.gmra.mxu0 %v336_v9 }
  0xc4   :  { %v253_v13 = vpop.f32.mrf.mxu3 }
  0xc5   :  { %v254_v14 = vadd.f32 %v253_v13, %v234_v11  ;;  %v273_v15 = vpop.f32.mrf.mxu0 }
  0xc6   :  { %v274_v16 = vadd.f32 %v273_v15, %v170_v12 }
  0xc7   :  { %v337_v17 = vmax.f32 %v254_v14, 0.0  ;;  %v293_v18 = vpop.f32.mrf.mxu1 }
  0xc8   :  { %v294_v19 = vadd.f32 %v293_v18, %v274_v16 }
  0xc9   :  { %444 = vmatmul.f32.vlgmr.msra.gmra.mxu1 %v337_v17 }
  0xca   :  { %v338_v21 = vmax.f32 %v294_v19, 0.0 }
  0xcb   :  { %v313_v22 = vpop.f32.mrf.mxu2 }
  0xcc   :  { %v314_v23 = vadd.f32 %v313_v22, %v171_v20  ;;  %464 = vmatmul.f32.vlgmr.msra.gmra.mxu2 %v338_v21 }
  0xcd   :  { %v333_v24 = vpop.f32.mrf.mxu3 }
  0xce   :  { %v334_v25 = vadd.f32 %v333_v24, %v314_v23 }
  0xd0   :  { %v339_v26 = vmax.f32 %v334_v25, 0.0 }
  0xd2   :  { %484 = vmatmul.f32.vlgmr.msra.gmra.mxu3 %v339_v26 }
 0x140   :  { %v425_v28 = vpop.f32.mrf.mxu0 }
 0x141   :  { %v426_v29 = vadd.f32 %v498_v27, %v425_v28 }
 0x146   :  { %v445_v30 = vpop.f32.mrf.mxu1 }
 0x147   :  { %v446_v32 = vadd.f32 %v445_v30, %v426_v29 }
 0x14f   :  { %v465_v31 = vpop.f32.mrf.mxu2 }
 0x150   :  { %v466_v33 = vadd.f32 %v465_v31, %v446_v32 }
 0x155   :  { %v485_v34 = vpop.f32.mrf.mxu3 }
 0x156   :  { %v486_v35 = vadd.f32 %v485_v34, %v466_v33 }
 0x158   :  { %489 = vst.msk [vmem:[%s773_s5] sm:$0xff] %vm488_vm0, %v486_v35 }
 0x159   :  { %494 = vsyncpa [#allocation3], 1 }

</bundles_post_ra>
